<compile_context>
chip_gen: v6e
topology: v6e:2x2x1
jax: 0.10.0
libtpu: 0.0.40
codegen_flags: <defaults>
</compile_context>

<pallas_src>
import jax
import jax.numpy as jnp
from jax.experimental import pallas as pl
from jax.experimental.pallas import tpu as pltpu

BN_EPS = 1e-5

# Synthetic categorical cardinalities (stand-in for the CSV-derived cat_dims).
CAT_DIMS = [15, 5, 2, 4]
EMBEDDING_DIMS = [(d, min(50, (d + 1) // 2)) for d in CAT_DIMS]   # [(15,8),(5,3),(2,1),(4,2)]
N_EMB = sum(e for _, e in EMBEDDING_DIMS)                          # 14
N_CAT = len(CAT_DIMS)
N_CONT = 5
N_IN = N_EMB + N_CONT                                              # 19
TOTAL_CARD = sum(CAT_DIMS)                                         # 26
LAYERS = [64, 32]
OUT_SZ = 1


# --------------------------------------------------------------------------------------
# Kernel
# --------------------------------------------------------------------------------------
def _fused_kernel(cat_ref, cont_ref, te_ref, w1c_ref, b1_ref,
                  w2_ref, b2_ref, w3_ref, b3_ref, o_ref):
    tb = cat_ref.shape[0]

    # Multi-hot encoding of all categorical columns over the stacked cardinality axis.
    iota = jax.lax.broadcasted_iota(jnp.int32, (tb, TOTAL_CARD), 1)
    mh = jnp.zeros((tb, TOTAL_CARD), jnp.float32)
    off = 0
    for i, card in enumerate(CAT_DIMS):
        mh = mh + (iota == (cat_ref[:, i:i + 1] + off)).astype(jnp.float32)
        off += card

    # Layer 1: embeddings folded into te_ref, bn_cont folded into w1c_ref / b1_ref.
    h = jnp.dot(mh.astype(jnp.bfloat16), te_ref[...],
                preferred_element_type=jnp.float32)
    h = h + jnp.dot(cont_ref[...].astype(jnp.bfloat16), w1c_ref[...],
                    preferred_element_type=jnp.float32)
    h = h + b1_ref[...]
    h = jnp.maximum(h, 0.0)

    # Layer 2: BN1 folded into w2_ref / b2_ref.
    h = jnp.dot(h.astype(jnp.bfloat16), w2_ref[...],
                preferred_element_type=jnp.float32) + b2_ref[...]
    h = jnp.maximum(h, 0.0)

    # Output head: BN2 folded into w3_ref / b3_ref.
    o_ref[...] = jnp.dot(h.astype(jnp.bfloat16), w3_ref[...],
                         preferred_element_type=jnp.float32) + b3_ref[...]


def _full_spec(shape):
    return pl.BlockSpec(shape, lambda i: (0, 0))


def fused_forward(cat, cont, te, w1c, b1, w2, b2, w3, b3, *, tile_b):
    pB = cat.shape[0]
    grid = (pB // tile_b,)
    in_specs = [
        pl.BlockSpec((tile_b, N_CAT), lambda i: (i, 0)),    # cat indices (int32)
        pl.BlockSpec((tile_b, N_CONT), lambda i: (i, 0)),   # continuous features
        _full_spec(te.shape),                               # stacked fused emb table (bf16)
        _full_spec(w1c.shape),                              # folded W1_cont (bf16)
        _full_spec(b1.shape),                               # folded b1 (f32)
        _full_spec(w2.shape),                               # folded W2 (bf16)
        _full_spec(b2.shape),                               # folded b2 (f32)
        _full_spec(w3.shape),                               # folded W3 (bf16)
        _full_spec(b3.shape),                               # folded b3 (f32)
    ]
    out_specs = pl.BlockSpec((tile_b, OUT_SZ), lambda i: (i, 0))
    return pl.pallas_call(
        _fused_kernel,
        out_shape=jax.ShapeDtypeStruct((pB, OUT_SZ), jnp.float32),
        grid=grid,
        in_specs=in_specs,
        out_specs=out_specs,
        compiler_params=pltpu.CompilerParams(dimension_semantics=("parallel",)),
    )(cat, cont, te, w1c, b1, w2, b2, w3, b3)


# --------------------------------------------------------------------------------------
# Parameter folding (done once in the wrapper; model is in eval mode)
# --------------------------------------------------------------------------------------
def _bn_fold(gamma, beta, mean, var, eps=BN_EPS):
    scale = gamma / jnp.sqrt(var + eps)
    shift = beta - mean * scale
    return scale, shift


def fold_params(params):
    h1, h2 = params["hidden"]
    out = params["out"]
    bc = params["bn_cont"]

    sc, tc = _bn_fold(bc["gamma"], bc["beta"], bc["mean"], bc["var"])
    s1, t1 = _bn_fold(h1["gamma"], h1["beta"], h1["mean"], h1["var"])
    s2, t2 = _bn_fold(h2["gamma"], h2["beta"], h2["mean"], h2["var"])

    W1, b1 = h1["w"], h1["b"]
    W1e, W1c = W1[:N_EMB, :], W1[N_EMB:, :]

    # Fold each embedding table through its slice of W1 -> stacked (TOTAL_CARD, H1).
    chunks, off = [], 0
    for (_, edim), tbl in zip(EMBEDDING_DIMS, params["emb"]):
        chunks.append(tbl @ W1e[off:off + edim, :])
        off += edim
    te = jnp.concatenate(chunks, axis=0)

    # Fold bn_cont into the continuous half of W1 / b1.
    w1c_f = sc[:, None] * W1c
    b1_f = b1 + tc @ W1c

    # Fold BN1 into W2 / b2, BN2 into W3 / b3.
    w2_f = s1[:, None] * h2["w"]
    b2_f = h2["b"] + t1 @ h2["w"]
    w3_f = s2[:, None] * out["w"]
    b3_f = out["b"] + t2 @ out["w"]

    return (te.astype(jnp.bfloat16),
            w1c_f.astype(jnp.bfloat16),
            b1_f.reshape(1, -1).astype(jnp.float32),
            w2_f.astype(jnp.bfloat16),
            b2_f.reshape(1, -1).astype(jnp.float32),
            w3_f.astype(jnp.bfloat16),
            b3_f.reshape(1, -1).astype(jnp.float32))


def _round_up(x, m):
    return ((x + m - 1) // m) * m


def model_forward(params, cat, cont, *, tile_b=512):
    B = cat.shape[0]
    folded = fold_params(params)
    tb = min(tile_b, _round_up(B, 8))
    pB = _round_up(B, tb)
    if pB != B:
        cat = jnp.pad(cat, ((0, pB - B), (0, 0)))
        cont = jnp.pad(cont, ((0, pB - B), (0, 0)))
    out = fused_forward(cat.astype(jnp.int32), cont.astype(jnp.float32),
                        *folded, tile_b=tb)
    return out[:B]


# --------------------------------------------------------------------------------------
# Pure-JAX f32 reference (unfused) for correctness checking
# --------------------------------------------------------------------------------------
def reference_forward(params, cat, cont):
    embs = [params["emb"][i][cat[:, i]] for i in range(len(params["emb"]))]
    bc = params["bn_cont"]
    sc, tc = _bn_fold(bc["gamma"], bc["beta"], bc["mean"], bc["var"])
    x = jnp.concatenate(embs + [cont * sc + tc], axis=1)
    for lay in params["hidden"]:
        s, t = _bn_fold(lay["gamma"], lay["beta"], lay["mean"], lay["var"])
        x = jnp.maximum(x @ lay["w"] + lay["b"], 0.0) * s + t
    return x @ params["out"]["w"] + params["out"]["b"]


def init_params(key):
    ks = iter(jax.random.split(key, 32))
    p = {}
    p["emb"] = [jax.random.normal(next(ks), (n, d), jnp.float32)
                for n, d in EMBEDDING_DIMS]
    p["bn_cont"] = dict(
        gamma=1.0 + 0.1 * jax.random.normal(next(ks), (N_CONT,), jnp.float32),
        beta=0.1 * jax.random.normal(next(ks), (N_CONT,), jnp.float32),
        mean=0.1 * jax.random.normal(next(ks), (N_CONT,), jnp.float32),
        var=1.0 + 0.1 * jax.random.uniform(next(ks), (N_CONT,), jnp.float32),
    )
    dims = [N_IN] + LAYERS
    p["hidden"] = []
    for i in range(len(LAYERS)):
        fan_in, fan_out = dims[i], dims[i + 1]
        p["hidden"].append(dict(
            w=0.1 * jax.random.normal(next(ks), (fan_in, fan_out), jnp.float32),
            b=0.01 * jax.random.normal(next(ks), (fan_out,), jnp.float32),
            gamma=1.0 + 0.1 * jax.random.normal(next(ks), (fan_out,), jnp.float32),
            beta=0.1 * jax.random.normal(next(ks), (fan_out,), jnp.float32),
            mean=0.1 * jax.random.normal(next(ks), (fan_out,), jnp.float32),
            var=1.0 + 0.1 * jax.random.uniform(next(ks), (fan_out,), jnp.float32),
        ))
    p["out"] = dict(
        w=0.1 * jax.random.normal(next(ks), (LAYERS[-1], OUT_SZ), jnp.float32),
        b=0.01 * jax.random.normal(next(ks), (OUT_SZ,), jnp.float32),
    )
    return p


if __name__ == "__main__":
    key = jax.random.PRNGKey(0)
    k_param, k_cat, k_cont = jax.random.split(key, 3)

    params = init_params(k_param)

    B = 8
    cat_cols = [jax.random.randint(jax.random.fold_in(k_cat, i), (B, 1), 0, n, jnp.int32)
                for i, (n, _) in enumerate(EMBEDDING_DIMS)]
    cat = jnp.concatenate(cat_cols, axis=1)                      # (B, 4) int32
    cont = jax.random.normal(k_cont, (B, N_CONT), jnp.float32)   # (B, 5) f32

    out = jax.block_until_ready(model_forward(params, cat, cont))
    assert out.shape == (B, OUT_SZ) and out.dtype == jnp.float32

    ref = reference_forward(params, cat, cont)
    max_err = float(jnp.max(jnp.abs(out - ref)))
    assert max_err < 5e-2, f"max abs error vs f32 reference: {max_err}"
    print("KERNEL_OK")
</pallas_src>

<mosaic_0001>
module attributes {stable_mosaic.version = 11 : i64} {
  func.func @_fused_kernel(%arg0: i32, %arg1: memref<8x4xi32, #tpu.memory_space<vmem>>, %arg2: memref<8x5xf32, #tpu.memory_space<vmem>>, %arg3: memref<26x64xbf16, #tpu.memory_space<vmem>>, %arg4: memref<5x64xbf16, #tpu.memory_space<vmem>>, %arg5: memref<1x64xf32, #tpu.memory_space<vmem>>, %arg6: memref<64x32xbf16, #tpu.memory_space<vmem>>, %arg7: memref<1x32xf32, #tpu.memory_space<vmem>>, %arg8: memref<32x1xbf16, #tpu.memory_space<vmem>>, %arg9: memref<1x1xf32, #tpu.memory_space<vmem>>, %arg10: memref<8x1xf32, #tpu.memory_space<vmem>>) attributes {dimension_semantics = [#tpu.dimension_semantics<parallel>], iteration_bounds = array<i64: 1>, scalar_prefetch = 0 : i64, scratch_operands = 0 : i64, tpu.core_type = #tpu.core_type<tc>, window_params = [{transform_indices = @transform_0, window_bounds = array<i64: 8, 4>}, {transform_indices = @transform_1, window_bounds = array<i64: 8, 5>}, {pipeline_mode = #tpu.pipeline_mode<synchronous>, transform_indices = @transform_2, window_bounds = array<i64: 26, 64>}, {pipeline_mode = #tpu.pipeline_mode<synchronous>, transform_indices = @transform_3, window_bounds = array<i64: 5, 64>}, {pipeline_mode = #tpu.pipeline_mode<synchronous>, transform_indices = @transform_4, window_bounds = array<i64: 1, 64>}, {pipeline_mode = #tpu.pipeline_mode<synchronous>, transform_indices = @transform_5, window_bounds = array<i64: 64, 32>}, {pipeline_mode = #tpu.pipeline_mode<synchronous>, transform_indices = @transform_6, window_bounds = array<i64: 1, 32>}, {pipeline_mode = #tpu.pipeline_mode<synchronous>, transform_indices = @transform_7, window_bounds = array<i64: 32, 1>}, {pipeline_mode = #tpu.pipeline_mode<synchronous>, transform_indices = @transform_8, window_bounds = array<i64: 1, 1>}, {transform_indices = @transform_9, window_bounds = array<i64: 8, 1>}]} {
    %0 = tpu.iota {dimensions = array<i32: 1>} : vector<8x26xi32>
    %cst = arith.constant 0.000000e+00 : f32
    %1 = vector.broadcast %cst : f32 to vector<8x26xf32>
    %c0 = arith.constant 0 : index
    %c0_0 = arith.constant 0 : index
    %2 = vector.load %arg1[%c0, %c0_0] : memref<8x4xi32, #tpu.memory_space<vmem>>, vector<8x1xi32>
    %c0_i32 = arith.constant 0 : i32
    %3 = vector.broadcast %c0_i32 : i32 to vector<8x1xi32>
    %4 = arith.addi %2, %3 : vector<8x1xi32>
    %5 = vector.broadcast %4 : vector<8x1xi32> to vector<8x26xi32>
    %6 = arith.cmpi eq, %0, %5 : vector<8x26xi32>
    %7 = arith.extui %6 : vector<8x26xi1> to vector<8x26xi32>
    %8 = arith.sitofp %7 : vector<8x26xi32> to vector<8x26xf32>
    %9 = arith.addf %1, %8 : vector<8x26xf32>
    %c0_1 = arith.constant 0 : index
    %c1 = arith.constant 1 : index
    %10 = vector.load %arg1[%c0_1, %c1] : memref<8x4xi32, #tpu.memory_space<vmem>>, vector<8x1xi32>
    %c15_i32 = arith.constant 15 : i32
    %11 = vector.broadcast %c15_i32 : i32 to vector<8x1xi32>
    %12 = arith.addi %10, %11 : vector<8x1xi32>
    %13 = vector.broadcast %12 : vector<8x1xi32> to vector<8x26xi32>
    %14 = arith.cmpi eq, %0, %13 : vector<8x26xi32>
    %15 = arith.extui %14 : vector<8x26xi1> to vector<8x26xi32>
    %16 = arith.sitofp %15 : vector<8x26xi32> to vector<8x26xf32>
    %17 = arith.addf %9, %16 : vector<8x26xf32>
    %c0_2 = arith.constant 0 : index
    %c2 = arith.constant 2 : index
    %18 = vector.load %arg1[%c0_2, %c2] : memref<8x4xi32, #tpu.memory_space<vmem>>, vector<8x1xi32>
    %c20_i32 = arith.constant 20 : i32
    %19 = vector.broadcast %c20_i32 : i32 to vector<8x1xi32>
    %20 = arith.addi %18, %19 : vector<8x1xi32>
    %21 = vector.broadcast %20 : vector<8x1xi32> to vector<8x26xi32>
    %22 = arith.cmpi eq, %0, %21 : vector<8x26xi32>
    %23 = arith.extui %22 : vector<8x26xi1> to vector<8x26xi32>
    %24 = arith.sitofp %23 : vector<8x26xi32> to vector<8x26xf32>
    %25 = arith.addf %17, %24 : vector<8x26xf32>
    %c0_3 = arith.constant 0 : index
    %c3 = arith.constant 3 : index
    %26 = vector.load %arg1[%c0_3, %c3] : memref<8x4xi32, #tpu.memory_space<vmem>>, vector<8x1xi32>
    %c22_i32 = arith.constant 22 : i32
    %27 = vector.broadcast %c22_i32 : i32 to vector<8x1xi32>
    %28 = arith.addi %26, %27 : vector<8x1xi32>
    %29 = vector.broadcast %28 : vector<8x1xi32> to vector<8x26xi32>
    %30 = arith.cmpi eq, %0, %29 : vector<8x26xi32>
    %31 = arith.extui %30 : vector<8x26xi1> to vector<8x26xi32>
    %32 = arith.sitofp %31 : vector<8x26xi32> to vector<8x26xf32>
    %33 = arith.addf %25, %32 : vector<8x26xf32>
    %34 = arith.truncf %33 : vector<8x26xf32> to vector<8x26xbf16>
    %c0_4 = arith.constant 0 : index
    %c0_5 = arith.constant 0 : index
    %35 = vector.load %arg3[%c0_4, %c0_5] : memref<26x64xbf16, #tpu.memory_space<vmem>>, vector<26x64xbf16>
    %cst_6 = arith.constant dense<0.000000e+00> : vector<8x64xf32>
    %36 = tpu.matmul %34, %35, %cst_6 {dimension_numbers = #tpu.dot_dimension_numbers<[1], [0], [0], [1], [0, 0, 1, 1], [], []>} : vector<8x26xbf16>, vector<26x64xbf16>, vector<8x64xf32> -> vector<8x64xf32>
    %c0_7 = arith.constant 0 : index
    %c0_8 = arith.constant 0 : index
    %37 = vector.load %arg2[%c0_7, %c0_8] : memref<8x5xf32, #tpu.memory_space<vmem>>, vector<8x5xf32>
    %38 = arith.truncf %37 : vector<8x5xf32> to vector<8x5xbf16>
    %c0_9 = arith.constant 0 : index
    %c0_10 = arith.constant 0 : index
    %39 = vector.load %arg4[%c0_9, %c0_10] : memref<5x64xbf16, #tpu.memory_space<vmem>>, vector<5x64xbf16>
    %cst_11 = arith.constant dense<0.000000e+00> : vector<8x64xf32>
    %40 = tpu.matmul %38, %39, %cst_11 {dimension_numbers = #tpu.dot_dimension_numbers<[1], [0], [0], [1], [0, 0, 1, 1], [], []>} : vector<8x5xbf16>, vector<5x64xbf16>, vector<8x64xf32> -> vector<8x64xf32>
    %41 = arith.addf %36, %40 : vector<8x64xf32>
    %c0_12 = arith.constant 0 : index
    %c0_13 = arith.constant 0 : index
    %42 = vector.load %arg5[%c0_12, %c0_13] : memref<1x64xf32, #tpu.memory_space<vmem>>, vector<1x64xf32>
    %43 = vector.broadcast %42 : vector<1x64xf32> to vector<8x64xf32>
    %44 = arith.addf %41, %43 : vector<8x64xf32>
    %cst_14 = arith.constant 0.000000e+00 : f32
    %45 = vector.broadcast %cst_14 : f32 to vector<8x64xf32>
    %46 = arith.maximumf %44, %45 : vector<8x64xf32>
    %47 = arith.truncf %46 : vector<8x64xf32> to vector<8x64xbf16>
    %c0_15 = arith.constant 0 : index
    %c0_16 = arith.constant 0 : index
    %48 = vector.load %arg6[%c0_15, %c0_16] : memref<64x32xbf16, #tpu.memory_space<vmem>>, vector<64x32xbf16>
    %cst_17 = arith.constant dense<0.000000e+00> : vector<8x32xf32>
    %49 = tpu.matmul %47, %48, %cst_17 {dimension_numbers = #tpu.dot_dimension_numbers<[1], [0], [0], [1], [0, 0, 1, 1], [], []>} : vector<8x64xbf16>, vector<64x32xbf16>, vector<8x32xf32> -> vector<8x32xf32>
    %c0_18 = arith.constant 0 : index
    %c0_19 = arith.constant 0 : index
    %50 = vector.load %arg7[%c0_18, %c0_19] : memref<1x32xf32, #tpu.memory_space<vmem>>, vector<1x32xf32>
    %51 = vector.broadcast %50 : vector<1x32xf32> to vector<8x32xf32>
    %52 = arith.addf %49, %51 : vector<8x32xf32>
    %cst_20 = arith.constant 0.000000e+00 : f32
    %53 = vector.broadcast %cst_20 : f32 to vector<8x32xf32>
    %54 = arith.maximumf %52, %53 : vector<8x32xf32>
    %55 = arith.truncf %54 : vector<8x32xf32> to vector<8x32xbf16>
    %c0_21 = arith.constant 0 : index
    %c0_22 = arith.constant 0 : index
    %56 = vector.load %arg8[%c0_21, %c0_22] : memref<32x1xbf16, #tpu.memory_space<vmem>>, vector<32x1xbf16>
    %cst_23 = arith.constant dense<0.000000e+00> : vector<8x1xf32>
    %57 = tpu.matmul %55, %56, %cst_23 {dimension_numbers = #tpu.dot_dimension_numbers<[1], [0], [0], [1], [0, 0, 1, 1], [], []>} : vector<8x32xbf16>, vector<32x1xbf16>, vector<8x1xf32> -> vector<8x1xf32>
    %c0_24 = arith.constant 0 : index
    %c0_25 = arith.constant 0 : index
    %58 = vector.load %arg9[%c0_24, %c0_25] : memref<1x1xf32, #tpu.memory_space<vmem>>, vector<1x1xf32>
    %59 = vector.broadcast %58 : vector<1x1xf32> to vector<8x1xf32>
    %60 = arith.addf %57, %59 : vector<8x1xf32>
    %c0_26 = arith.constant 0 : index
    %c0_27 = arith.constant 0 : index
    %61 = vector.load %arg10[%c0_26, %c0_27] : memref<8x1xf32, #tpu.memory_space<vmem>>, vector<8x1xf32>
    tpu.vector_store %arg10[%c0_26, %c0_27], %60 {strides = array<i32>} : memref<8x1xf32, #tpu.memory_space<vmem>>, vector<8x1xf32>,
    return
  }
  func.func @transform_0(%arg0: i32) -> (i32, i32) {
    %c0_i32 = arith.constant 0 : i32
    %c0_i32_0 = arith.constant 0 : i32
    return %arg0, %c0_i32 : i32, i32
  }
  func.func @transform_1(%arg0: i32) -> (i32, i32) {
    %c0_i32 = arith.constant 0 : i32
    %c0_i32_0 = arith.constant 0 : i32
    return %arg0, %c0_i32 : i32, i32
  }
  func.func @transform_2(%arg0: i32) -> (i32, i32) {
    %c0_i32 = arith.constant 0 : i32
    %c0_i32_0 = arith.constant 0 : i32
    %c0_i32_1 = arith.constant 0 : i32
    return %c0_i32, %c0_i32_0 : i32, i32
  }
  func.func @transform_3(%arg0: i32) -> (i32, i32) {
    %c0_i32 = arith.constant 0 : i32
    %c0_i32_0 = arith.constant 0 : i32
    %c0_i32_1 = arith.constant 0 : i32
    return %c0_i32, %c0_i32_0 : i32, i32
  }
  func.func @transform_4(%arg0: i32) -> (i32, i32) {
    %c0_i32 = arith.constant 0 : i32
    %c0_i32_0 = arith.constant 0 : i32
    %c0_i32_1 = arith.constant 0 : i32
    return %c0_i32, %c0_i32_0 : i32, i32
  }
  func.func @transform_5(%arg0: i32) -> (i32, i32) {
    %c0_i32 = arith.constant 0 : i32
    %c0_i32_0 = arith.constant 0 : i32
    %c0_i32_1 = arith.constant 0 : i32
    return %c0_i32, %c0_i32_0 : i32, i32
  }
  func.func @transform_6(%arg0: i32) -> (i32, i32) {
    %c0_i32 = arith.constant 0 : i32
    %c0_i32_0 = arith.constant 0 : i32
    %c0_i32_1 = arith.constant 0 : i32
    return %c0_i32, %c0_i32_0 : i32, i32
  }
  func.func @transform_7(%arg0: i32) -> (i32, i32) {
    %c0_i32 = arith.constant 0 : i32
    %c0_i32_0 = arith.constant 0 : i32
    %c0_i32_1 = arith.constant 0 : i32
    return %c0_i32, %c0_i32_0 : i32, i32
  }
  func.func @transform_8(%arg0: i32) -> (i32, i32) {
    %c0_i32 = arith.constant 0 : i32
    %c0_i32_0 = arith.constant 0 : i32
    %c0_i32_1 = arith.constant 0 : i32
    return %c0_i32, %c0_i32_0 : i32, i32
  }
  func.func @transform_9(%arg0: i32) -> (i32, i32) {
    %c0_i32 = arith.constant 0 : i32
    %c0_i32_0 = arith.constant 0 : i32
    return %arg0, %c0_i32 : i32, i32
  }
}

</mosaic_0001>

<bundles_post_ra>
// kernel: tpu_custom_call.1
= control target key start
LH: loop header
LB: loop body
LE: loop exit
PB: predicated region body
PF: predicated region fallthrough
CT: control target
= control target key end

     0   :  { %v441_v0 = vmov 0   ;;  %v442_v2 = vmov 2   ;;  %vm81_vm0 = vcmask 1041408   ;;  %vm82_vm1 = vcmask 1042432   ;;  %s564_s0 = inlined_call_operand.vmem [shape: s32[8,4], index: 0, kind: input, shape index: {}]   ;;  %s565_s3 = inlined_call_operand.vmem [shape: bf16[5,64], index: 3, kind: input, shape index: {}]   ;;  %s566_s2 = inlined_call_operand.vmem [shape: bf16[26,64], index: 2, kind: input, shape index: {}]   ;;  %s567_s1 = inlined_call_operand.vmem [shape: f32[8,5], index: 1, kind: input, shape index: {}]   ;;  %s568_s5 = inlined_call_operand.vmem [shape: bf16[64,32], index: 5, kind: input, shape index: {}]   ;;  %s569_s7 = inlined_call_operand.vmem [shape: bf16[32,1], index: 7, kind: input, shape index: {}]   ;;  %s570_s4 = inlined_call_operand.vmem [shape: f32[1,64], index: 4, kind: input, shape index: {}]   ;;  %s571_s8 = inlined_call_operand.<no memory space> [shape: f32[1,1], index: 8, kind: input, shape index: {}]   ;;  %s572_s6 = inlined_call_operand.vmem [shape: f32[1,32], index: 6, kind: input, shape index: {}]   ;;  %s573_s9 = inlined_call_operand.vmem [shape: f32[8,1], index: 9, kind: output, shape index: {}]  }
   0x1   :  { %428 = vset.pattern.permute.xlu0 %v441_v0  ;;  %v37_v1 = vld [vmem:[%s564_s0] sm:$0xff]  ;;  %430 = vset.pattern.permute.xlu1 %v442_v2  ;;  %v443_v4 = vmov 0.0   ;;  %v444_v7 = vmov 65535   ;;  %v433_v10 = vld [vmem:[%s566_s2 + $0x8] sm:$0x1f]   ;;  %vm143_vm2 = vcmask 1044480   ;;  %v35_v21 = vlaneseq }
   0x2   :  { %39 = vperm.xlu0 %428, %v37_v1   ;;  %v53_v3 = vadd.s32 20, %v37_v1  ;;  %387 = vmatprep.subr.bf16.mxu0 %v443_v4  ;;  %v76_v5 = vld [vmem:[%s565_s3] sm:$0x7]  ;;  %v45_v6 = vadd.s32 15, %v37_v1  ;;  %v83_v8 = vsel %vm81_vm0, 4294967295, %v444_v7  ;;  %v61_v12 = vadd.s32 22, %v37_v1 }
   0x3   :  { %393 = vmatprep.subr.bf16.mxu1 %v443_v4  ;;  %v84_v9 = vsel %vm82_vm1, %v83_v8, 0  ;;  %v74_v11 = vld [vmem:[%s567_s1] sm:$0xff]  ;;  %v445_v14 = vmov 1   ;;  %vm446_vm3 = vmmov 0   ;;  %v145_v15 = vsel %vm143_vm2, %v433_v10, 0  ;;  %v435_v19 = vld [vmem:[%s568_s5 + $0x18] sm:$0xff]  }
   0x4   :  { %55 = vperm.xlu1 %430, %v53_v3   ;;  %v86_v13 = vand.u32 %v84_v9, %v76_v5  ;;  %389 = vmatprep.mubr.msk.bf16.mxu0 %vm446_vm3, %v443_v4  ;;  %v75_v16 = vpack.c.bf16 %v74_v11, %v74_v11  ;;  %vm77_vm4 = vcmask 39936   ;;  %v447_v17 = vmov 3   ;;  %v434_v18 = vld [vmem:[%s566_s2] sm:$0xff]   ;;  %v436_v20 = vld [vmem:[%s568_s5 + $0x10] sm:$0xff]   ;;  %v437_v37 = vld [vmem:[%s568_s5 + $0x8] sm:$0xff]  }
   0x5   :  { %394 = vmatpush3.bf16.msra.mxu1 %v145_v15  ;;  %397 = vmatprep.mubr.msk.bf16.mxu1 %vm446_vm3, %v443_v4  ;;  %v36_v22 = vand.u32 127, %v35_v21  ;;  %vm139_vm9 = vcmask 211968   ;;  %v438_v40 = vld [vmem:[%s568_s5] sm:$0xff]   ;;  %v439_v41 = vld [vmem:[%s569_s7 + $0x8] sm:$0xff]   ;;  %vm236_vm10 = vcmask 523264   ;;  %v14_v52 = vstv %s571_s8 }
   0x6   :  { %429 = vset.pattern.permute.xlu0 %v445_v14  ;;  %388 = vmatpush3.bf16.msra.mxu0 %v86_v13  ;;  %v363_v43 = vld [vmem:[%s570_s4] ss:$0 sm:$0xff]  ;;  %15 = vst [vmem:[#allocation2] sm:$0x1] %v14_v52  ;;  %vm305_vm11 = vcmask 261120   ;;  %vm349_vm12 = vcmask 7168  }
   0x7   :  { %47 = vperm.xlu0 %429, %v45_v6   ;;  %395 = vmatprep.subr.bf16.mxu1 %v443_v4  ;;  %v440_v51 = vld [vmem:[%s569_s7] sm:$0xff]  }
   0x8   :  { %431 = vset.pattern.permute.xlu1 %v447_v17  ;;  %401 = vmatprep.subr.bf16.mxu0 %v443_v4  ;;  %v364_v53 = vld [vmem:[%s572_s6] ss:$0 sm:$0xff] }
   0x9   :  { %63 = vperm.xlu1 %431, %v61_v12   ;;  %390 = vmatmul.mubr.msk.bf16.vlgmr.msra.gmra.mxu0 %vm77_vm4, %v75_v16 }
   0xa   :  { %409 = vmatprep.mubr.msk.bf16.mxu0 %vm446_vm3, %v443_v4  ;;  %396 = vmatpush3.bf16.msra.mxu1 %v434_v18 }
   0xb   :  { %432 = vset.pattern.permute.xlu0 %v447_v17  ;;  %413 = vmatprep.subr.bf16.mxu1 %v443_v4 }
   0xc   :  { %402 = vmatpush3.bf16.msra.mxu0 %v435_v19 }
   0xd   :  { %403 = vmatprep.subr.bf16.mxu0 %v443_v4  ;;  %v370_v61 = vld [vmem:[#allocation2] ss:$0 sm:$0xff] }
  0x10   :  { %404 = vmatpush3.bf16.msra.mxu0 %v436_v20 }
  0x11   :  { %405 = vmatprep.subr.bf16.mxu0 %v443_v4 }
  0x14   :  { %406 = vmatpush3.bf16.msra.mxu0 %v437_v37 }
  0x15   :  { %407 = vmatprep.subr.bf16.mxu0 %v443_v4 }
  0x18   :  { %408 = vmatpush3.bf16.msra.mxu0 %v438_v40 }
  0x7d   :  { %v40_v23 = vpop.permute.xlu0 %39 }
  0x7e   :  { %vm41_vm5 = vcmp.eq.s32.totalorder %v36_v22, %v40_v23 }
  0x7f   :  { %v56_v24 = vpop.permute.xlu1 %55  ;;  %v355_v26 = vsel %vm41_vm5, 1.0, %v443_v4 }
  0x80   :  { %vm57_vm6 = vcmp.eq.s32.totalorder %v36_v22, %v56_v24 }
  0x81   :  { %v357_v30 = vsel %vm57_vm6, 1.0, %v443_v4 }
  0x82   :  { %v48_v25 = vpop.permute.xlu0 %47 }
  0x83   :  { %vm49_vm7 = vcmp.eq.s32.totalorder %v36_v22, %v48_v25 }
  0x84   :  { %v356_v27 = vsel %vm49_vm7, 1.0, %v443_v4  ;;  %v64_v28 = vpop.permute.xlu1 %63 }
  0x85   :  { %v52_v29 = vadd.f32 %v356_v27, %v355_v26  ;;  %vm65_vm8 = vcmp.eq.s32.totalorder %v36_v22, %v64_v28 }
  0x86   :  { %v358_v31 = vsel %vm65_vm8, 1.0, %v443_v4 }
  0x87   :  { %v60_v32 = vadd.f32 %v357_v30, %v52_v29 }
  0x89   :  { %v68_v33 = vadd.f32 %v358_v31, %v60_v32 }
  0x8b   :  { %v69_v34 = vpack.c.bf16 %v68_v33, %v68_v33 }
  0x8d   :  { %398 = vmatmul.mubr.msk.bf16.vlgmr.msra.gmra.mxu1 %vm139_vm9, %v69_v34 }
  0x8e   :  { %417 = vmatprep.mubr.msk.bf16.mxu1 %vm446_vm3, %v443_v4  ;;  %414 = vmatpush3.bf16.msra.mxu1 %v439_v41 }
  0x8f   :  { %415 = vmatprep.subr.bf16.mxu1 %v443_v4 }
  0x92   :  { %416 = vmatpush3.bf16.msra.mxu1 %v440_v51 }
  0xc9   :  { %v122_v35 = vpop.f32.mrf.mxu0 }
  0xcb   :  { %v391_v36 = vpop.f32.mrf.mxu0 }
  0xcd   :  { %v125_v38 = vpop.f32.mrf.mxu0 }
  0xcf   :  { %v392_v39 = vpop.f32.mrf.mxu0 }
 0x14d   :  { %v181_v42 = vpop.f32.mrf.mxu1 }
 0x14e   :  { %v182_v44 = vadd.f32 %v181_v42, %v122_v35 }
 0x14f   :  { %v399_v45 = vpop.f32.mrf.mxu1 }
 0x150   :  { %v194_v46 = vadd.f32 %v363_v43, %v182_v44 }
 0x151   :  { %v184_v47 = vpop.f32.mrf.mxu1 }
 0x152   :  { %v195_v48 = vmax.f32 %v194_v46, 0.0 }
 0x153   :  { %v400_v49 = vpop.f32.mrf.mxu1 }
 0x154   :  { %v196_v50 = vpack.c.bf16 %v195_v48, %v195_v48 }
 0x156   :  { %410 = vmatmul.mubr.msk.bf16.vlgmr.msra.gmra.mxu0 %vm236_vm10, %v196_v50 }
 0x216   :  { %v274_v54 = vpop.f32.mrf.mxu0 }
 0x217   :  { %v275_v55 = vadd.f32 %v364_v53, %v274_v54 }
 0x218   :  { %v411_v56 = vpop.f32.mrf.mxu0 }
 0x219   :  { %v280_v57 = vmax.f32 %v275_v55, 0.0 }
 0x21a   :  { %v277_v58 = vpop.f32.mrf.mxu0 }
 0x21b   :  { %v281_v59 = vpack.c.bf16 %v280_v57, %v280_v57 }
 0x21c   :  { %v412_v60 = vpop.f32.mrf.mxu0 }
 0x21d   :  { %418 = vmatmul.mubr.msk.bf16.vlgmr.msra.gmra.mxu1 %vm305_vm11, %v281_v59 }
 0x2dd   :  { %v343_v62 = vpop.f32.mrf.mxu1 }
 0x2de   :  { %v344_v63 = vadd.f32 %v370_v61, %v343_v62 }
 0x2df   :  { %v419_v0 = vpop.f32.mrf.mxu1 }
 0x2e0   :  { %350 = vst.msk [vmem:[%s573_s9] sm:$0xff] %vm349_vm12, %v344_v63 }
 0x2e1   :  { %v346_v1 = vpop.f32.mrf.mxu1 }
 0x2e3   :  { %v420_v2 = vpop.f32.mrf.mxu1 }

</bundles_post_ra>
